<compile_context>
chip_gen: v5e
topology: v5e:2x2
jax: 0.10.0
libtpu: 0.0.40
codegen_flags: <defaults>
</compile_context>

<pallas_src>
import functools

import numpy as np
import jax
import jax.numpy as jnp
from jax.experimental import pallas as pl
from jax.experimental.pallas import tpu as pltpu

EPS = 1e-5
SUBLANE = 8  # f32 sublane granularity


# ---------------------------------------------------------------------------
# Host-side, compile-time constants: tap-validity masks for the 9 (dy, dx) taps.
# ---------------------------------------------------------------------------
def make_tap_masks(H, W):
    row = np.repeat(np.arange(H), W)
    col = np.tile(np.arange(W), H)
    m = np.ones((9, H * W), np.float32)
    i = 0
    for dy in (-1, 0, 1):
        for dx in (-1, 0, 1):
            valid = ((row + dy >= 0) & (row + dy < H) &
                     (col + dx >= 0) & (col + dx < W))
            m[i] = valid.astype(np.float32)
            i += 1
    return jnp.asarray(m)  # (9, H*W), index = (dy+1)*3 + (dx+1)


# ---------------------------------------------------------------------------
# In-kernel helper: 3x3 "same" conv (BN scale pre-folded into weights) + shift + ReLU
# on a (C, H*W) slab.  Per-dy accumulation: 3 matmuls of K=3*C.
# ---------------------------------------------------------------------------
def _conv3x3_bn_relu(x, w_ref, shift, masks, W):
    # x: (C, L) f32, w_ref: VMEM ref (3, Co, 3*C), shift: (Co, 1), masks: (9, L)
    C, L = x.shape
    acc = None
    for g, dy in enumerate((-1, 0, 1)):
        taps = []
        for t, dx in enumerate((-1, 0, 1)):
            d = dy * W + dx
            if d == 0:
                taps.append(x)                                   # center tap: no mask
            else:
                # tap[c, p] = x[c, p + d] if neighbour inside image else 0
                shifted = pltpu.roll(x, shift=(-d) % L, axis=1)  # XLU, off the VPU slot
                taps.append(shifted * masks[3 * g + t:3 * g + t + 1, :])
        grp = jnp.concatenate(taps, axis=0)                      # (3*C, L), sublane-aligned
        part = jnp.dot(w_ref[g], grp, preferred_element_type=jnp.float32)
        acc = part if acc is None else acc + part
    return jnp.maximum(acc + shift, 0.0)                         # (Co, L)


# ---------------------------------------------------------------------------
# Fused kernel: conv1+BN+ReLU -> conv2+BN+ReLU -> ConvTranspose2x2 (as matmul).
# ---------------------------------------------------------------------------
def fused_decoder_kernel(x_ref, m_ref, w1_ref, sh1_ref, w2_ref, sh2_ref,
                         wt_ref, bt_ref, o_ref, *, W):
    # x_ref : (Cin_p, H*W)        one batch element, channels-major lane-dense
    # m_ref : (9, H*W)            precomputed tap masks (f32 0/1)
    # w1_ref: (3, Cmid, 3*Cin_p)  per-dy conv1 weight groups (BN scale folded in)
    # w2_ref: (3, Cmid, 3*Cmid)   per-dy conv2 weight groups (BN scale folded in)
    # sh*   : (Cmid, 1)           folded BN shifts
    # wt_ref: (4*Cout, Cmid)      deconv weights, rows ordered (co, dy, dx)
    # bt_ref: (4*Cout, 1)
    # o_ref : (4*Cout, H*W)       lane-dense output slab
    masks = m_ref[...]
    h1 = _conv3x3_bn_relu(x_ref[...], w1_ref, sh1_ref[...], masks, W)
    h2 = _conv3x3_bn_relu(h1, w2_ref, sh2_ref[...], masks, W)
    o_ref[...] = (jnp.dot(wt_ref[...], h2, preferred_element_type=jnp.float32)
                  + bt_ref[...])


# ---------------------------------------------------------------------------
# One-time (outside-jit) parameter preparation: BN fold into weights, sublane
# padding, kernel-ready per-dy layouts.
# ---------------------------------------------------------------------------
def _pad_to(a, axis, target):
    pad = target - a.shape[axis]
    if pad <= 0:
        return a
    widths = [(0, 0)] * a.ndim
    widths[axis] = (0, pad)
    return jnp.pad(a, widths)


def prepare_params(p):
    mid, cin = p["w1"].shape[0], p["w1"].shape[1]
    cout = p["wT"].shape[1]
    cin_p = cin + (-cin) % SUBLANE
    mid_p = mid + (-mid) % SUBLANE

    def fold(b, g, be, m, v):
        scale = g / jnp.sqrt(v + EPS)
        shift = (b - m) * scale + be
        return scale, shift

    s1, sh1 = fold(p["b1"], p["g1"], p["be1"], p["m1"], p["v1"])
    s2, sh2 = fold(p["b2"], p["g2"], p["be2"], p["m2"], p["v2"])

    def conv_weight(w_oihw, scale, i_pad, o_pad):
        # fold BN scale into output channels, pad I/O to sublane multiples,
        # OIHW -> (ky, O, kx, I) -> (3, O_pad, 3*I_pad); matches (dx, ci) tap order.
        w = w_oihw * scale[:, None, None, None]
        w = _pad_to(_pad_to(w, 1, i_pad), 0, o_pad)
        return jnp.transpose(w, (2, 0, 3, 1)).reshape(3, o_pad, 3 * i_pad)

    # deconv IOHW (Cmid, Cout, 2, 2) -> (Cout, dy, dx, Cmid_p) -> (4*Cout, Cmid_p)
    wt = jnp.transpose(p["wT"], (1, 2, 3, 0))
    wt = _pad_to(wt, 3, mid_p).reshape(4 * cout, mid_p)

    kp = dict(
        w1=conv_weight(p["w1"], s1, cin_p, mid_p),
        sh1=_pad_to(sh1.reshape(-1, 1), 0, mid_p),
        w2=conv_weight(p["w2"], s2, mid_p, mid_p),
        sh2=_pad_to(sh2.reshape(-1, 1), 0, mid_p),
        wt=wt,
        bt=jnp.repeat(p["bT"], 4).reshape(4 * cout, 1),
    )
    return {k: jnp.asarray(v, jnp.float32) for k, v in kp.items()}


# ---------------------------------------------------------------------------
# Forward pass: single pallas_call + one XLA pixel-shuffle of the final output.
# ---------------------------------------------------------------------------
def decoder_block(x_nchw, kp):
    N, Cin, H, W = x_nchw.shape
    _, Cmid, k1 = kp["w1"].shape
    cin_p = k1 // 3
    Cout4 = kp["wt"].shape[0]
    Cout = Cout4 // 4
    L = H * W

    x_flat = x_nchw.reshape(N, Cin, L)          # free, contiguous reshape
    if cin_p > Cin:                              # sublane-pad channels (review item)
        x_flat = jnp.pad(x_flat, ((0, 0), (0, cin_p - Cin), (0, 0)))
    masks = make_tap_masks(H, W)                 # compile-time constant, (9, L)

    # Explicit VMEM budget (v7x: 64 MiB/TC physical, 32 MiB scoped default).
    itemsize = 4
    block_bytes = itemsize * (
        2 * cin_p * L + 2 * Cout4 * L            # double-buffered x / out blocks
        + 9 * L                                  # masks
        + 3 * Cmid * (3 * cin_p) + 3 * Cmid * (3 * Cmid) + Cout4 * Cmid
        + 2 * Cmid + Cout4                       # weights + shifts/bias
        + 3 * max(cin_p, Cmid) * L               # largest live per-dy patch group
        + 2 * Cmid * L                           # h1 / h2
    )
    vmem_limit = int(min(64 * 1024 * 1024, max(4 * 1024 * 1024, 2 * block_bytes)))

    kernel = functools.partial(fused_decoder_kernel, W=W)
    y4 = pl.pallas_call(
        kernel,
        out_shape=jax.ShapeDtypeStruct((N, Cout4, L), jnp.float32),
        grid=(N,),
        in_specs=[
            pl.BlockSpec((None, cin_p, L), lambda n: (n, 0, 0)),
            pl.BlockSpec((9, L), lambda n: (0, 0)),
            pl.BlockSpec((3, Cmid, 3 * cin_p), lambda n: (0, 0, 0)),
            pl.BlockSpec((Cmid, 1), lambda n: (0, 0)),
            pl.BlockSpec((3, Cmid, 3 * Cmid), lambda n: (0, 0, 0)),
            pl.BlockSpec((Cmid, 1), lambda n: (0, 0)),
            pl.BlockSpec((Cout4, Cmid), lambda n: (0, 0)),
            pl.BlockSpec((Cout4, 1), lambda n: (0, 0)),
        ],
        out_specs=pl.BlockSpec((None, Cout4, L), lambda n: (n, 0, 0)),
        compiler_params=pltpu.CompilerParams(
            dimension_semantics=("parallel",),
            vmem_limit_bytes=vmem_limit),
    )(x_flat, masks, kp["w1"], kp["sh1"], kp["w2"], kp["sh2"], kp["wt"], kp["bt"])

    # (dy, dx) pixel-shuffle de-interleave of the lane-dense slab.
    # row index of y4 is co*4 + dy*2 + dx  ->  out[n, co, 2h+dy, 2w+dx]
    # TODO(synk): fold this de-interleave into the downstream consumer kernel; as a
    # standalone block it is one extra HBM read+write of the output.
    y = y4.reshape(N, Cout, 2, 2, H, W).transpose(0, 1, 4, 2, 5, 3)
    return y.reshape(N, Cout, 2 * H, 2 * W)


# ---------------------------------------------------------------------------
# Deterministic parameters (PyTorch layouts) + pure-JAX reference.
# ---------------------------------------------------------------------------
def make_params(key, in_c, mid_c, out_c):
    ks = jax.random.split(key, 12)
    p = {}
    p["w1"] = 0.1 * jax.random.normal(ks[0], (mid_c, in_c, 3, 3), jnp.float32)   # OIHW
    p["b1"] = 0.1 * jax.random.normal(ks[1], (mid_c,), jnp.float32)
    p["g1"] = 1.0 + 0.1 * jax.random.normal(ks[2], (mid_c,), jnp.float32)
    p["be1"] = 0.1 * jax.random.normal(ks[3], (mid_c,), jnp.float32)
    p["m1"] = 0.1 * jax.random.normal(ks[4], (mid_c,), jnp.float32)
    p["v1"] = 1.0 + 0.1 * jax.random.uniform(ks[5], (mid_c,), jnp.float32)
    p["w2"] = 0.1 * jax.random.normal(ks[6], (mid_c, mid_c, 3, 3), jnp.float32)
    p["b2"] = 0.1 * jax.random.normal(ks[7], (mid_c,), jnp.float32)
    p["g2"] = 1.0 + 0.1 * jax.random.normal(ks[8], (mid_c,), jnp.float32)
    p["be2"] = 0.1 * jax.random.normal(ks[9], (mid_c,), jnp.float32)
    p["m2"] = 0.1 * jax.random.normal(ks[10], (mid_c,), jnp.float32)
    p["v2"] = 1.0 + 0.1 * jax.random.uniform(ks[11], (mid_c,), jnp.float32)
    kT1, kT2 = jax.random.split(jax.random.fold_in(key, 99))
    p["wT"] = 0.1 * jax.random.normal(kT1, (mid_c, out_c, 2, 2), jnp.float32)     # IOHW
    p["bT"] = 0.1 * jax.random.normal(kT2, (out_c,), jnp.float32)
    return p


def reference(x, p):
    def conv_bn_relu(x, w, b, g, be, m, v):
        y = jax.lax.conv_general_dilated(
            x, w, (1, 1), ((1, 1), (1, 1)),
            dimension_numbers=("NCHW", "OIHW", "NCHW"))
        y = y + b[None, :, None, None]
        scale = g / jnp.sqrt(v + EPS)
        y = (y - m[None, :, None, None]) * scale[None, :, None, None] + be[None, :, None, None]
        return jnp.maximum(y, 0.0)

    h = conv_bn_relu(x, p["w1"], p["b1"], p["g1"], p["be1"], p["m1"], p["v1"])
    h = conv_bn_relu(h, p["w2"], p["b2"], p["g2"], p["be2"], p["m2"], p["v2"])
    N, C, H, W = h.shape
    Cout = p["wT"].shape[1]
    y = jnp.einsum("nchw,cokl->nohwkl", h, p["wT"])
    y = y.transpose(0, 1, 2, 4, 3, 5).reshape(N, Cout, 2 * H, 2 * W)
    return y + p["bT"][None, :, None, None]


if __name__ == "__main__":
    key = jax.random.PRNGKey(0)
    kx, kparam = jax.random.split(key)
    N, Cin, Cmid, Cout, H, W = 2, 4, 8, 4, 16, 16
    x = jax.random.normal(kx, (N, Cin, H, W), jnp.float32)
    params = make_params(kparam, Cin, Cmid, Cout)
    kready = prepare_params(params)           # one-time weight prep, outside the jit

    out = jax.jit(decoder_block)(x, kready)
    out = jax.block_until_ready(out)

    ref = reference(x, params)
    assert out.shape == (N, Cout, 2 * H, 2 * W), out.shape
    err = float(jnp.max(jnp.abs(out - ref)))
    assert jnp.allclose(out, ref, rtol=1e-3, atol=1e-3), err
    print("KERNEL_OK")
</pallas_src>

<mosaic_0001>
module attributes {stable_mosaic.version = 11 : i64} {
  func.func @fused_decoder_kernel(%arg0: i32, %arg1: memref<1x8x256xf32, #tpu.memory_space<vmem>>, %arg2: memref<9x256xf32, #tpu.memory_space<vmem>>, %arg3: memref<3x8x24xf32, #tpu.memory_space<vmem>>, %arg4: memref<8x1xf32, #tpu.memory_space<vmem>>, %arg5: memref<3x8x24xf32, #tpu.memory_space<vmem>>, %arg6: memref<8x1xf32, #tpu.memory_space<vmem>>, %arg7: memref<16x8xf32, #tpu.memory_space<vmem>>, %arg8: memref<16x1xf32, #tpu.memory_space<vmem>>, %arg9: memref<1x16x256xf32, #tpu.memory_space<vmem>>) attributes {dimension_semantics = [#tpu.dimension_semantics<parallel>], iteration_bounds = array<i64: 2>, scalar_prefetch = 0 : i64, scratch_operands = 0 : i64, tpu.core_type = #tpu.core_type<tc>, window_params = [{transform_indices = @transform_0, window_bounds = array<i64: 1, 8, 256>}, {pipeline_mode = #tpu.pipeline_mode<synchronous>, transform_indices = @transform_1, window_bounds = array<i64: 9, 256>}, {pipeline_mode = #tpu.pipeline_mode<synchronous>, transform_indices = @transform_2, window_bounds = array<i64: 3, 8, 24>}, {pipeline_mode = #tpu.pipeline_mode<synchronous>, transform_indices = @transform_3, window_bounds = array<i64: 8, 1>}, {pipeline_mode = #tpu.pipeline_mode<synchronous>, transform_indices = @transform_4, window_bounds = array<i64: 3, 8, 24>}, {pipeline_mode = #tpu.pipeline_mode<synchronous>, transform_indices = @transform_5, window_bounds = array<i64: 8, 1>}, {pipeline_mode = #tpu.pipeline_mode<synchronous>, transform_indices = @transform_6, window_bounds = array<i64: 16, 8>}, {pipeline_mode = #tpu.pipeline_mode<synchronous>, transform_indices = @transform_7, window_bounds = array<i64: 16, 1>}, {transform_indices = @transform_8, window_bounds = array<i64: 1, 16, 256>}]} {
    %c0 = arith.constant 0 : index
    %c0_0 = arith.constant 0 : index
    %0 = vector.load %arg2[%c0, %c0_0] : memref<9x256xf32, #tpu.memory_space<vmem>>, vector<9x256xf32>
    %c0_1 = arith.constant 0 : index
    %c0_2 = arith.constant 0 : index
    %c0_3 = arith.constant 0 : index
    %1 = vector.load %arg1[%c0_1, %c0_2, %c0_3] : memref<1x8x256xf32, #tpu.memory_space<vmem>>, vector<1x8x256xf32>
    %2 = vector.shape_cast %1 : vector<1x8x256xf32> to vector<8x256xf32>
    %c0_4 = arith.constant 0 : index
    %c0_5 = arith.constant 0 : index
    %3 = vector.load %arg4[%c0_4, %c0_5] : memref<8x1xf32, #tpu.memory_space<vmem>>, vector<8x1xf32>
    %c17_i32 = arith.constant 17 : i32
    %4 = tpu.dynamic_rotate %2 by %c17_i32 dim 1 : vector<8x256xf32>, i32 -> vector<8x256xf32>
    %5 = vector.extract_strided_slice %0 {offsets = [0, 0], sizes = [1, 256], strides = [1, 1]} : vector<9x256xf32> to vector<1x256xf32>
    %6 = vector.broadcast %5 : vector<1x256xf32> to vector<8x256xf32>
    %7 = arith.mulf %4, %6 : vector<8x256xf32>
    %c16_i32 = arith.constant 16 : i32
    %8 = tpu.dynamic_rotate %2 by %c16_i32 dim 1 : vector<8x256xf32>, i32 -> vector<8x256xf32>
    %9 = vector.extract_strided_slice %0 {offsets = [1, 0], sizes = [1, 256], strides = [1, 1]} : vector<9x256xf32> to vector<1x256xf32>
    %10 = vector.broadcast %9 : vector<1x256xf32> to vector<8x256xf32>
    %11 = arith.mulf %8, %10 : vector<8x256xf32>
    %c15_i32 = arith.constant 15 : i32
    %12 = tpu.dynamic_rotate %2 by %c15_i32 dim 1 : vector<8x256xf32>, i32 -> vector<8x256xf32>
    %13 = vector.extract_strided_slice %0 {offsets = [2, 0], sizes = [1, 256], strides = [1, 1]} : vector<9x256xf32> to vector<1x256xf32>
    %14 = vector.broadcast %13 : vector<1x256xf32> to vector<8x256xf32>
    %15 = arith.mulf %12, %14 : vector<8x256xf32>
    %16 = tpu.concatenate %7, %11, %15 in 0 : vector<8x256xf32>, vector<8x256xf32>, vector<8x256xf32> -> vector<24x256xf32>
    %c0_6 = arith.constant 0 : index
    %c0_7 = arith.constant 0 : index
    %c0_8 = arith.constant 0 : index
    %17 = vector.load %arg3[%c0_6, %c0_7, %c0_8] : memref<3x8x24xf32, #tpu.memory_space<vmem>>, vector<1x8x24xf32>
    %18 = vector.shape_cast %17 : vector<1x8x24xf32> to vector<8x24xf32>
    %cst = arith.constant dense<0.000000e+00> : vector<8x256xf32>
    %19 = tpu.matmul %18, %16, %cst {dimension_numbers = #tpu.dot_dimension_numbers<[1], [0], [0], [1], [0, 0, 1, 1], [], []>} : vector<8x24xf32>, vector<24x256xf32>, vector<8x256xf32> -> vector<8x256xf32>
    %c1_i32 = arith.constant 1 : i32
    %20 = tpu.dynamic_rotate %2 by %c1_i32 dim 1 : vector<8x256xf32>, i32 -> vector<8x256xf32>
    %21 = vector.extract_strided_slice %0 {offsets = [3, 0], sizes = [1, 256], strides = [1, 1]} : vector<9x256xf32> to vector<1x256xf32>
    %22 = vector.broadcast %21 : vector<1x256xf32> to vector<8x256xf32>
    %23 = arith.mulf %20, %22 : vector<8x256xf32>
    %c255_i32 = arith.constant 255 : i32
    %24 = tpu.dynamic_rotate %2 by %c255_i32 dim 1 : vector<8x256xf32>, i32 -> vector<8x256xf32>
    %25 = vector.extract_strided_slice %0 {offsets = [5, 0], sizes = [1, 256], strides = [1, 1]} : vector<9x256xf32> to vector<1x256xf32>
    %26 = vector.broadcast %25 : vector<1x256xf32> to vector<8x256xf32>
    %27 = arith.mulf %24, %26 : vector<8x256xf32>
    %28 = tpu.concatenate %23, %2, %27 in 0 : vector<8x256xf32>, vector<8x256xf32>, vector<8x256xf32> -> vector<24x256xf32>
    %c1 = arith.constant 1 : index
    %c0_9 = arith.constant 0 : index
    %c0_10 = arith.constant 0 : index
    %29 = vector.load %arg3[%c1, %c0_9, %c0_10] : memref<3x8x24xf32, #tpu.memory_space<vmem>>, vector<1x8x24xf32>
    %30 = vector.shape_cast %29 : vector<1x8x24xf32> to vector<8x24xf32>
    %cst_11 = arith.constant dense<0.000000e+00> : vector<8x256xf32>
    %31 = tpu.matmul %30, %28, %cst_11 {dimension_numbers = #tpu.dot_dimension_numbers<[1], [0], [0], [1], [0, 0, 1, 1], [], []>} : vector<8x24xf32>, vector<24x256xf32>, vector<8x256xf32> -> vector<8x256xf32>
    %32 = arith.addf %19, %31 : vector<8x256xf32>
    %c241_i32 = arith.constant 241 : i32
    %33 = tpu.dynamic_rotate %2 by %c241_i32 dim 1 : vector<8x256xf32>, i32 -> vector<8x256xf32>
    %34 = vector.extract_strided_slice %0 {offsets = [6, 0], sizes = [1, 256], strides = [1, 1]} : vector<9x256xf32> to vector<1x256xf32>
    %35 = vector.broadcast %34 : vector<1x256xf32> to vector<8x256xf32>
    %36 = arith.mulf %33, %35 : vector<8x256xf32>
    %c240_i32 = arith.constant 240 : i32
    %37 = tpu.dynamic_rotate %2 by %c240_i32 dim 1 : vector<8x256xf32>, i32 -> vector<8x256xf32>
    %38 = vector.extract_strided_slice %0 {offsets = [7, 0], sizes = [1, 256], strides = [1, 1]} : vector<9x256xf32> to vector<1x256xf32>
    %39 = vector.broadcast %38 : vector<1x256xf32> to vector<8x256xf32>
    %40 = arith.mulf %37, %39 : vector<8x256xf32>
    %c239_i32 = arith.constant 239 : i32
    %41 = tpu.dynamic_rotate %2 by %c239_i32 dim 1 : vector<8x256xf32>, i32 -> vector<8x256xf32>
    %42 = vector.extract_strided_slice %0 {offsets = [8, 0], sizes = [1, 256], strides = [1, 1]} : vector<9x256xf32> to vector<1x256xf32>
    %43 = vector.broadcast %42 : vector<1x256xf32> to vector<8x256xf32>
    %44 = arith.mulf %41, %43 : vector<8x256xf32>
    %45 = tpu.concatenate %36, %40, %44 in 0 : vector<8x256xf32>, vector<8x256xf32>, vector<8x256xf32> -> vector<24x256xf32>
    %c2 = arith.constant 2 : index
    %c0_12 = arith.constant 0 : index
    %c0_13 = arith.constant 0 : index
    %46 = vector.load %arg3[%c2, %c0_12, %c0_13] : memref<3x8x24xf32, #tpu.memory_space<vmem>>, vector<1x8x24xf32>
    %47 = vector.shape_cast %46 : vector<1x8x24xf32> to vector<8x24xf32>
    %cst_14 = arith.constant dense<0.000000e+00> : vector<8x256xf32>
    %48 = tpu.matmul %47, %45, %cst_14 {dimension_numbers = #tpu.dot_dimension_numbers<[1], [0], [0], [1], [0, 0, 1, 1], [], []>} : vector<8x24xf32>, vector<24x256xf32>, vector<8x256xf32> -> vector<8x256xf32>
    %49 = arith.addf %32, %48 : vector<8x256xf32>
    %50 = vector.broadcast %3 : vector<8x1xf32> to vector<8x256xf32>
    %51 = arith.addf %49, %50 : vector<8x256xf32>
    %cst_15 = arith.constant 0.000000e+00 : f32
    %52 = vector.broadcast %cst_15 : f32 to vector<8x256xf32>
    %53 = arith.maximumf %51, %52 : vector<8x256xf32>
    %c0_16 = arith.constant 0 : index
    %c0_17 = arith.constant 0 : index
    %54 = vector.load %arg6[%c0_16, %c0_17] : memref<8x1xf32, #tpu.memory_space<vmem>>, vector<8x1xf32>
    %c17_i32_18 = arith.constant 17 : i32
    %55 = tpu.dynamic_rotate %53 by %c17_i32_18 dim 1 : vector<8x256xf32>, i32 -> vector<8x256xf32>
    %56 = vector.extract_strided_slice %0 {offsets = [0, 0], sizes = [1, 256], strides = [1, 1]} : vector<9x256xf32> to vector<1x256xf32>
    %57 = vector.broadcast %56 : vector<1x256xf32> to vector<8x256xf32>
    %58 = arith.mulf %55, %57 : vector<8x256xf32>
    %c16_i32_19 = arith.constant 16 : i32
    %59 = tpu.dynamic_rotate %53 by %c16_i32_19 dim 1 : vector<8x256xf32>, i32 -> vector<8x256xf32>
    %60 = vector.extract_strided_slice %0 {offsets = [1, 0], sizes = [1, 256], strides = [1, 1]} : vector<9x256xf32> to vector<1x256xf32>
    %61 = vector.broadcast %60 : vector<1x256xf32> to vector<8x256xf32>
    %62 = arith.mulf %59, %61 : vector<8x256xf32>
    %c15_i32_20 = arith.constant 15 : i32
    %63 = tpu.dynamic_rotate %53 by %c15_i32_20 dim 1 : vector<8x256xf32>, i32 -> vector<8x256xf32>
    %64 = vector.extract_strided_slice %0 {offsets = [2, 0], sizes = [1, 256], strides = [1, 1]} : vector<9x256xf32> to vector<1x256xf32>
    %65 = vector.broadcast %64 : vector<1x256xf32> to vector<8x256xf32>
    %66 = arith.mulf %63, %65 : vector<8x256xf32>
    %67 = tpu.concatenate %58, %62, %66 in 0 : vector<8x256xf32>, vector<8x256xf32>, vector<8x256xf32> -> vector<24x256xf32>
    %c0_21 = arith.constant 0 : index
    %c0_22 = arith.constant 0 : index
    %c0_23 = arith.constant 0 : index
    %68 = vector.load %arg5[%c0_21, %c0_22, %c0_23] : memref<3x8x24xf32, #tpu.memory_space<vmem>>, vector<1x8x24xf32>
    %69 = vector.shape_cast %68 : vector<1x8x24xf32> to vector<8x24xf32>
    %cst_24 = arith.constant dense<0.000000e+00> : vector<8x256xf32>
    %70 = tpu.matmul %69, %67, %cst_24 {dimension_numbers = #tpu.dot_dimension_numbers<[1], [0], [0], [1], [0, 0, 1, 1], [], []>} : vector<8x24xf32>, vector<24x256xf32>, vector<8x256xf32> -> vector<8x256xf32>
    %c1_i32_25 = arith.constant 1 : i32
    %71 = tpu.dynamic_rotate %53 by %c1_i32_25 dim 1 : vector<8x256xf32>, i32 -> vector<8x256xf32>
    %72 = vector.extract_strided_slice %0 {offsets = [3, 0], sizes = [1, 256], strides = [1, 1]} : vector<9x256xf32> to vector<1x256xf32>
    %73 = vector.broadcast %72 : vector<1x256xf32> to vector<8x256xf32>
    %74 = arith.mulf %71, %73 : vector<8x256xf32>
    %c255_i32_26 = arith.constant 255 : i32
    %75 = tpu.dynamic_rotate %53 by %c255_i32_26 dim 1 : vector<8x256xf32>, i32 -> vector<8x256xf32>
    %76 = vector.extract_strided_slice %0 {offsets = [5, 0], sizes = [1, 256], strides = [1, 1]} : vector<9x256xf32> to vector<1x256xf32>
    %77 = vector.broadcast %76 : vector<1x256xf32> to vector<8x256xf32>
    %78 = arith.mulf %75, %77 : vector<8x256xf32>
    %79 = tpu.concatenate %74, %53, %78 in 0 : vector<8x256xf32>, vector<8x256xf32>, vector<8x256xf32> -> vector<24x256xf32>
    %c1_27 = arith.constant 1 : index
    %c0_28 = arith.constant 0 : index
    %c0_29 = arith.constant 0 : index
    %80 = vector.load %arg5[%c1_27, %c0_28, %c0_29] : memref<3x8x24xf32, #tpu.memory_space<vmem>>, vector<1x8x24xf32>
    %81 = vector.shape_cast %80 : vector<1x8x24xf32> to vector<8x24xf32>
    %cst_30 = arith.constant dense<0.000000e+00> : vector<8x256xf32>
    %82 = tpu.matmul %81, %79, %cst_30 {dimension_numbers = #tpu.dot_dimension_numbers<[1], [0], [0], [1], [0, 0, 1, 1], [], []>} : vector<8x24xf32>, vector<24x256xf32>, vector<8x256xf32> -> vector<8x256xf32>
    %83 = arith.addf %70, %82 : vector<8x256xf32>
    %c241_i32_31 = arith.constant 241 : i32
    %84 = tpu.dynamic_rotate %53 by %c241_i32_31 dim 1 : vector<8x256xf32>, i32 -> vector<8x256xf32>
    %85 = vector.extract_strided_slice %0 {offsets = [6, 0], sizes = [1, 256], strides = [1, 1]} : vector<9x256xf32> to vector<1x256xf32>
    %86 = vector.broadcast %85 : vector<1x256xf32> to vector<8x256xf32>
    %87 = arith.mulf %84, %86 : vector<8x256xf32>
    %c240_i32_32 = arith.constant 240 : i32
    %88 = tpu.dynamic_rotate %53 by %c240_i32_32 dim 1 : vector<8x256xf32>, i32 -> vector<8x256xf32>
    %89 = vector.extract_strided_slice %0 {offsets = [7, 0], sizes = [1, 256], strides = [1, 1]} : vector<9x256xf32> to vector<1x256xf32>
    %90 = vector.broadcast %89 : vector<1x256xf32> to vector<8x256xf32>
    %91 = arith.mulf %88, %90 : vector<8x256xf32>
    %c239_i32_33 = arith.constant 239 : i32
    %92 = tpu.dynamic_rotate %53 by %c239_i32_33 dim 1 : vector<8x256xf32>, i32 -> vector<8x256xf32>
    %93 = vector.extract_strided_slice %0 {offsets = [8, 0], sizes = [1, 256], strides = [1, 1]} : vector<9x256xf32> to vector<1x256xf32>
    %94 = vector.broadcast %93 : vector<1x256xf32> to vector<8x256xf32>
    %95 = arith.mulf %92, %94 : vector<8x256xf32>
    %96 = tpu.concatenate %87, %91, %95 in 0 : vector<8x256xf32>, vector<8x256xf32>, vector<8x256xf32> -> vector<24x256xf32>
    %c2_34 = arith.constant 2 : index
    %c0_35 = arith.constant 0 : index
    %c0_36 = arith.constant 0 : index
    %97 = vector.load %arg5[%c2_34, %c0_35, %c0_36] : memref<3x8x24xf32, #tpu.memory_space<vmem>>, vector<1x8x24xf32>
    %98 = vector.shape_cast %97 : vector<1x8x24xf32> to vector<8x24xf32>
    %cst_37 = arith.constant dense<0.000000e+00> : vector<8x256xf32>
    %99 = tpu.matmul %98, %96, %cst_37 {dimension_numbers = #tpu.dot_dimension_numbers<[1], [0], [0], [1], [0, 0, 1, 1], [], []>} : vector<8x24xf32>, vector<24x256xf32>, vector<8x256xf32> -> vector<8x256xf32>
    %100 = arith.addf %83, %99 : vector<8x256xf32>
    %101 = vector.broadcast %54 : vector<8x1xf32> to vector<8x256xf32>
    %102 = arith.addf %100, %101 : vector<8x256xf32>
    %cst_38 = arith.constant 0.000000e+00 : f32
    %103 = vector.broadcast %cst_38 : f32 to vector<8x256xf32>
    %104 = arith.maximumf %102, %103 : vector<8x256xf32>
    %c0_39 = arith.constant 0 : index
    %c0_40 = arith.constant 0 : index
    %105 = vector.load %arg7[%c0_39, %c0_40] : memref<16x8xf32, #tpu.memory_space<vmem>>, vector<16x8xf32>
    %cst_41 = arith.constant dense<0.000000e+00> : vector<16x256xf32>
    %106 = tpu.matmul %105, %104, %cst_41 {dimension_numbers = #tpu.dot_dimension_numbers<[1], [0], [0], [1], [0, 0, 1, 1], [], []>} : vector<16x8xf32>, vector<8x256xf32>, vector<16x256xf32> -> vector<16x256xf32>
    %c0_42 = arith.constant 0 : index
    %c0_43 = arith.constant 0 : index
    %107 = vector.load %arg8[%c0_42, %c0_43] : memref<16x1xf32, #tpu.memory_space<vmem>>, vector<16x1xf32>
    %108 = vector.broadcast %107 : vector<16x1xf32> to vector<16x256xf32>
    %109 = arith.addf %106, %108 : vector<16x256xf32>
    %c0_44 = arith.constant 0 : index
    %c0_45 = arith.constant 0 : index
    %c0_46 = arith.constant 0 : index
    %110 = vector.load %arg9[%c0_44, %c0_45, %c0_46] : memref<1x16x256xf32, #tpu.memory_space<vmem>>, vector<1x16x256xf32>
    %111 = vector.shape_cast %110 : vector<1x16x256xf32> to vector<16x256xf32>
    %112 = vector.shape_cast %109 : vector<16x256xf32> to vector<1x16x256xf32>
    tpu.vector_store %arg9[%c0_44, %c0_45, %c0_46], %112 {strides = array<i32>} : memref<1x16x256xf32, #tpu.memory_space<vmem>>, vector<1x16x256xf32>,
    return
  }
  func.func @transform_0(%arg0: i32) -> (i32, i32, i32) {
    %c0_i32 = arith.constant 0 : i32
    %c0_i32_0 = arith.constant 0 : i32
    %c0_i32_1 = arith.constant 0 : i32
    return %arg0, %c0_i32, %c0_i32_0 : i32, i32, i32
  }
  func.func @transform_1(%arg0: i32) -> (i32, i32) {
    %c0_i32 = arith.constant 0 : i32
    %c0_i32_0 = arith.constant 0 : i32
    %c0_i32_1 = arith.constant 0 : i32
    return %c0_i32, %c0_i32_0 : i32, i32
  }
  func.func @transform_2(%arg0: i32) -> (i32, i32, i32) {
    %c0_i32 = arith.constant 0 : i32
    %c0_i32_0 = arith.constant 0 : i32
    %c0_i32_1 = arith.constant 0 : i32
    %c0_i32_2 = arith.constant 0 : i32
    return %c0_i32, %c0_i32_0, %c0_i32_1 : i32, i32, i32
  }
  func.func @transform_3(%arg0: i32) -> (i32, i32) {
    %c0_i32 = arith.constant 0 : i32
    %c0_i32_0 = arith.constant 0 : i32
    %c0_i32_1 = arith.constant 0 : i32
    return %c0_i32, %c0_i32_0 : i32, i32
  }
  func.func @transform_4(%arg0: i32) -> (i32, i32, i32) {
    %c0_i32 = arith.constant 0 : i32
    %c0_i32_0 = arith.constant 0 : i32
    %c0_i32_1 = arith.constant 0 : i32
    %c0_i32_2 = arith.constant 0 : i32
    return %c0_i32, %c0_i32_0, %c0_i32_1 : i32, i32, i32
  }
  func.func @transform_5(%arg0: i32) -> (i32, i32) {
    %c0_i32 = arith.constant 0 : i32
    %c0_i32_0 = arith.constant 0 : i32
    %c0_i32_1 = arith.constant 0 : i32
    return %c0_i32, %c0_i32_0 : i32, i32
  }
  func.func @transform_6(%arg0: i32) -> (i32, i32) {
    %c0_i32 = arith.constant 0 : i32
    %c0_i32_0 = arith.constant 0 : i32
    %c0_i32_1 = arith.constant 0 : i32
    return %c0_i32, %c0_i32_0 : i32, i32
  }
  func.func @transform_7(%arg0: i32) -> (i32, i32) {
    %c0_i32 = arith.constant 0 : i32
    %c0_i32_0 = arith.constant 0 : i32
    %c0_i32_1 = arith.constant 0 : i32
    return %c0_i32, %c0_i32_0 : i32, i32
  }
  func.func @transform_8(%arg0: i32) -> (i32, i32, i32) {
    %c0_i32 = arith.constant 0 : i32
    %c0_i32_0 = arith.constant 0 : i32
    %c0_i32_1 = arith.constant 0 : i32
    return %arg0, %c0_i32, %c0_i32_0 : i32, i32, i32
  }
}

</mosaic_0001>

<bundles_post_ra>
// kernel: decoder_block.1
= control target key start
LH: loop header
LB: loop body
LE: loop exit
PB: predicated region body
PF: predicated region fallthrough
CT: control target
= control target key end

     0   :  { %s1002_s27 = smov 0   ;;  %s1271_s0 = inlined_call_operand.vmem [shape: f32[2,8,256], index: 0, kind: input, shape index: {}]   ;;  %s1272_s1 = inlined_call_operand.vmem [shape: f32[9,256], index: 1, kind: input, shape index: {}]   ;;  %s1273_s2 = inlined_call_operand.vmem [shape: f32[3,8,24], index: 2, kind: input, shape index: {}]   ;;  %s1274_s3 = inlined_call_operand.vmem [shape: f32[8,1], index: 3, kind: input, shape index: {}]   ;;  %s1275_s4 = inlined_call_operand.vmem [shape: f32[3,8,24], index: 4, kind: input, shape index: {}]   ;;  %s1276_s5 = inlined_call_operand.vmem [shape: f32[8,1], index: 5, kind: input, shape index: {}]   ;;  %s1277_s6 = inlined_call_operand.vmem [shape: f32[16,8], index: 6, kind: input, shape index: {}]   ;;  %s1278_s7 = inlined_call_operand.vmem [shape: f32[16,1], index: 7, kind: input, shape index: {}]   ;;  %s1279_s8 = inlined_call_operand.vmem [shape: f32[2,16,256], index: 8, kind: output, shape index: {}]  }
   0x1 LB: > { %s885_s28 = sadd.s32 4294967295, %s946_s27   ;;  %p889_p0 = scmp.ge.s32.totalorder %s946_s27, 1  ;;  %s946_s27 = sphi %s1002_s27, %s18_s27  }
   0x2   : > { %p262_p1 = scmp.lt.s32.totalorder %s946_s27, 3 }
   0x4   : > { %p263_p2 = pnand %p889_p0, %p262_p1 }
   0x5   : > { %p296_p3 = scmp.lt.s32.totalorder (!%p263_p2), %s885_s28, 1  ;;  %s948_s11 = smov (!%p263_p2), 1  }
   0x6   : > { %266 = sbr.rel (%p263_p2) target bundleno = 732 (0x2dc), region = 52  ;;  %s949_s12 = smov (!%p263_p2), 127  }
   0x7   : > { %s950_s13 = smov (!%p263_p2), 15   ;;  %s951_s14 = smov (!%p263_p2), 16  }
   0x8   : > { %s952_s15 = smov (!%p263_p2), 17   ;;  %s953_s16 = smov (!%p263_p2), 111  }
   0x9   : > { %s954_s17 = smov (!%p263_p2), 112   ;;  %s955_s18 = smov (!%p263_p2), 113  }
   0xb   : > { %s1281_s28 = smov (!%p296_p3, %s885_s28), 1  ;;  %v317_v3 = vlaneseq  ;;  %v1037_v7 = vld [vmem:[%s1272_s1] sm:$0xff]  ;;  %v1042_v8 = vld [vmem:[%s1272_s1 + $0x8] sm:$0xff]  ;;  %vm373_vm4 = vcmask 195584   ;;  %v956_v34 = vmov 0   ;;  %vm773_vm9 = vcmask 64512  }
   0xc   : > { %s916_s29 = sshll.u32 %s1281_s28, 4  ;;  %v367_v10 = vperm.slane %v1037_v7, 5  ;;  %v368_v11 = vperm.slane %v1042_v8, 5  ;;  %v356_v18 = vperm.slane %v1037_v7, 3  ;;  %v357_v19 = vperm.slane %v1042_v8, 3  ;;  %v894_v33 = vld [vmem:[%s1273_s2 + $0x8] sm:$0xff]  ;;  %935 = vset.pattern.permute.xlu1 %v956_v34  ;;  %936 = vset.pattern.permute.xlu0 %v956_v34 }
   0xd   : > { %s300_s10 = scalar_lea.vmem %s1271_s0, %s916_s29  ;;  %v1032_v6 = vand.u32 127, %v317_v3  ;;  %v344_v22 = vperm.slane %v1037_v7, 2  ;;  %v345_v23 = vperm.slane %v1042_v8, 2  ;;  %v333_v29 = vperm.slane %v1037_v7, 1  ;;  %v312_v37 = vld [vmem:[%s1274_s3] sm:$0xff]  ;;  %937 = vset.pattern.permute.xlu2 %v956_v34  ;;  %s917_s19 = sshll.u32 %s1281_s28, 5 }
   0xe   : > { %v310_v0 = vld [vmem:[%s300_s10] sm:$0xff]  ;;  %v311_v1 = vld [vmem:[%s300_s10 + $0x8] sm:$0xff]  ;;  %v334_v30 = vperm.slane %v1042_v8, 1  ;;  %v322_v42 = vperm.slane %v1037_v7, 0  ;;  %v323_v43 = vperm.slane %v1042_v8, 0  ;;  %v478_v58 = vperm.slane %v1037_v7, 7  ;;  %s305_s22 = scalar_lea.vmem %s1279_s8, %s917_s19 }
   0xf   : > { %349 = vrot.lane.b32.xlu1 %v310_v0, %s948_s11  ;;  %360 = vrot.lane.b32.xlu0 %v310_v0, %s949_s12  ;;  %vm364_vm0 = vcmp.lt.s32.totalorder %v1032_v6, 127  ;;  %vm353_vm1 = vcmp.lt.s32.totalorder %v1032_v6, 1  ;;  %vm341_vm2 = vcmp.lt.s32.totalorder %v1032_v6, 15  ;;  %vm330_vm3 = vcmp.lt.s32.totalorder %v1032_v6, 16  ;;  %v1103_v45 = vld [vmem:[%s1272_s1 + $0x10] ss:$0 sm:$0xff] }
  0x10   : > { %337 = vrot.lane.b32.xlu2 %v310_v0, %s950_s13  ;;  %vm319_vm5 = vcmp.lt.s32.totalorder %v1032_v6, 17  ;;  %vm486_vm6 = vcmp.lt.s32.totalorder %v1032_v6, 111  ;;  %v1108_v46 = vld [vmem:[%s1272_s1 + $0x18] ss:$0 sm:$0xff]  ;;  %v348_v55 = vld [vmem:[%s1273_s2] sm:$0xff]  ;;  %vm475_vm7 = vcmp.lt.s32.totalorder %v1032_v6, 112 }
  0x11   : > { %v479_v59 = vperm.slane %v1042_v8, 7  ;;  %vm464_vm8 = vcmp.lt.s32.totalorder %v1032_v6, 113  ;;  %v467_v3 = vperm.slane %v1037_v7, 6  ;;  %v762_v6 = vld [vmem:[%s1278_s7 + $0x8] sm:$0xff] }
  0x17   : > { %351 = vrot.lane.b32.xlu1 %v311_v1, %s948_s11  ;;  %362 = vrot.lane.b32.xlu0 %v311_v1, %s949_s12 }
  0x18   : > { %339 = vrot.lane.b32.xlu2 %v311_v1, %s950_s13 }
  0x1f   : > { %328 = vrot.lane.b32.xlu1 %v311_v1, %s951_s14  ;;  %326 = vrot.lane.b32.xlu0 %v310_v0, %s951_s14 }
  0x20   : > { %313 = vrot.lane.b32.xlu2 %v310_v0, %s952_s15 }
  0x27   : > { %482 = vrot.lane.b32.xlu1 %v310_v0, %s953_s16  ;;  %315 = vrot.lane.b32.xlu0 %v311_v1, %s952_s15 }
  0x28   : > { %484 = vrot.lane.b32.xlu2 %v311_v1, %s953_s16 }
  0x2f   : > { %473 = vrot.lane.b32.xlu1 %v311_v1, %s954_s17  ;;  %471 = vrot.lane.b32.xlu0 %v310_v0, %s954_s17 }
  0x30   : > { %460 = vrot.lane.b32.xlu2 %v310_v0, %s955_s18 }
  0x37   : > { %462 = vrot.lane.b32.xlu0 %v311_v1, %s955_s18  ;;  %542 = vperm.xlu1 %935, %v312_v37   ;;  %v761_v37 = vld [vmem:[%s1278_s7] sm:$0xff] }
  0x6a   : > { %v338_v2 = vpop.permute.xlu2 %337 }
  0x72   : > { %v340_v9 = vpop.permute.xlu2 %339 }
  0x73   : > { %v342_v24 = vsel %vm341_vm2, %v338_v2, %v340_v9  ;;  %v343_v25 = vsel %vm341_vm2, %v340_v9, %v338_v2 }
  0x74   : > { %v346_v31 = vmul.f32 %v344_v22, %v343_v25  ;;  %v347_v32 = vmul.f32 %v345_v23, %v342_v24 }
  0x7a   : > { %v314_v26 = vpop.permute.xlu2 %313 }
  0x81   : > { %v350_v4 = vpop.permute.xlu1 %349  ;;  %v361_v5 = vpop.permute.xlu0 %360 }
  0x82   : > { %v485_v44 = vpop.permute.xlu2 %484 }
  0x89   : > { %v352_v12 = vpop.permute.xlu1 %351  ;;  %v363_v13 = vpop.permute.xlu0 %362 }
  0x8a   : > { %v365_v14 = vsel %vm364_vm0, %v361_v5, %v363_v13  ;;  %v366_v15 = vsel %vm364_vm0, %v363_v13, %v361_v5  ;;  %v354_v20 = vsel %vm353_vm1, %v350_v4, %v352_v12  ;;  %v355_v21 = vsel %vm353_vm1, %v352_v12, %v350_v4  ;;  %v461_v2 = vpop.permute.xlu2 %460 }
  0x8b   : > { %v369_v16 = vmul.f32 %v367_v10, %v365_v14  ;;  %v370_v17 = vmul.f32 %v368_v11, %v366_v15  ;;  %v358_v27 = vmul.f32 %v356_v18, %v355_v21  ;;  %v359_v28 = vmul.f32 %v357_v19, %v354_v20  ;;  %v899_v15 = vld [vmem:[%s1273_s2 + $0x10] sm:$0xff] }
  0x8c   : > { %v468_v4 = vperm.slane %v1042_v8, 6 }
  0x8d   : > { %390 = vmatpush.msra.mxu2 %v369_v16  ;;  %410 = vmatpush.msra.mxu3 %v370_v17 }
  0x8f   : > { %391 = vmatpush.msra.mxu2 %v310_v0  ;;  %411 = vmatpush.msra.mxu3 %v311_v1 }
  0x91   : > { %v329_v35 = vpop.permute.xlu1 %328  ;;  %392 = vmatpush.msra.mxu2 %v358_v27  ;;  %412 = vmatpush.msra.mxu3 %v359_v28  ;;  %v327_v36 = vpop.permute.xlu0 %326 }
  0x92   : > { %v331_v38 = vsel %vm330_vm3, %v327_v36, %v329_v35  ;;  %v332_v39 = vsel %vm330_vm3, %v329_v35, %v327_v36  ;;  %896 = vmatmul.msk.f32.vlgmr.msra.gmra.mxu3 %vm373_vm4, %v894_v33  ;;  %895 = vmatmul.msk.f32.vlgmr.msra.gmra.mxu2 %vm373_vm4, %v894_v33 }
  0x93   : > { %433 = vmatpush.msrb.mxu2 %v346_v31  ;;  %453 = vmatpush.msrb.mxu3 %v347_v32  ;;  %v335_v40 = vmul.f32 %v333_v29, %v332_v39  ;;  %v336_v41 = vmul.f32 %v334_v30, %v331_v38 }
  0x95   : > { %434 = vmatpush.msrb.mxu2 %v335_v40  ;;  %454 = vmatpush.msrb.mxu3 %v336_v41 }
  0x99   : > { %v483_v47 = vpop.permute.xlu1 %482  ;;  %v316_v48 = vpop.permute.xlu0 %315 }
  0x9a   : > { %v320_v49 = vsel %vm319_vm5, %v314_v26, %v316_v48  ;;  %v321_v50 = vsel %vm319_vm5, %v316_v48, %v314_v26  ;;  %v487_v51 = vsel %vm486_vm6, %v483_v47, %v485_v44  ;;  %v488_v52 = vsel %vm486_vm6, %v485_v44, %v483_v47 }
  0x9b   : > { %v324_v53 = vmul.f32 %v322_v42, %v321_v50  ;;  %v325_v54 = vmul.f32 %v323_v43, %v320_v49  ;;  %v491_v56 = vmul.f32 %v1103_v45, %v487_v51  ;;  %v492_v57 = vmul.f32 %v1108_v46, %v488_v52 }
  0x9d   : > { %435 = vmatpush.msrb.mxu2 %v324_v53  ;;  %455 = vmatpush.msrb.mxu3 %v325_v54 }
  0x9e   : > { %898 = vmatmul.msk.f32.vlgmr.msrb.gmra.mxu3 %vm373_vm4, %v348_v55  ;;  %897 = vmatmul.msk.f32.vlgmr.msrb.gmra.mxu2 %vm373_vm4, %v348_v55 }
  0x9f   : > { %511 = vmatpush.msra.mxu0 %v491_v56  ;;  %531 = vmatpush.msra.mxu1 %v492_v57  ;;  %v549_v56 = vld [vmem:[%s1276_s5] sm:$0xff] }
  0xa1   : > { %v474_v60 = vpop.permute.xlu1 %473  ;;  %v472_v61 = vpop.permute.xlu0 %471 }
  0xa2   : > { %v476_v62 = vsel %vm475_vm7, %v472_v61, %v474_v60  ;;  %v477_v63 = vsel %vm475_vm7, %v474_v60, %v472_v61 }
  0xa3   : > { %v480_v0 = vmul.f32 %v478_v58, %v476_v62  ;;  %v481_v1 = vmul.f32 %v479_v59, %v477_v63 }
  0xa5   : > { %512 = vmatpush.msra.mxu0 %v480_v0  ;;  %532 = vmatpush.msra.mxu1 %v481_v1 }
  0xa9   : > { %v463_v5 = vpop.permute.xlu0 %462  ;;  %v543_v26 = vpop.permute.xlu1 %542 }
  0xaa   : > { %v465_v9 = vsel %vm464_vm8, %v461_v2, %v463_v5  ;;  %v466_v12 = vsel %vm464_vm8, %v463_v5, %v461_v2 }
  0xab   : > { %v469_v13 = vmul.f32 %v467_v3, %v465_v9  ;;  %v470_v14 = vmul.f32 %v468_v4, %v466_v12 }
  0xad   : > { %513 = vmatpush.msra.mxu0 %v469_v13  ;;  %533 = vmatpush.msra.mxu1 %v470_v14 }
  0xae   : > { %900 = vmatmul.msk.f32.vlgmr.msra.gmra.mxu0 %vm373_vm4, %v899_v15  ;;  %901 = vmatmul.msk.f32.vlgmr.msra.gmra.mxu1 %vm373_vm4, %v899_v15 }
 0x115   : > { %v414_v16 = vpop.f32.mrf.mxu3  ;;  %v394_v17 = vpop.f32.mrf.mxu2 }
 0x121   : > { %v457_v20 = vpop.f32.mrf.mxu3  ;;  %v437_v21 = vpop.f32.mrf.mxu2 }
 0x122   : > { %v458_v24 = vadd.f32 %v457_v20, %v414_v16  ;;  %v438_v25 = vadd.f32 %v437_v21, %v394_v17 }
 0x12b   : > { %v515_v27 = vpop.f32.mrf.mxu0  ;;  %v535_v28 = vpop.f32.mrf.mxu1 }
 0x12c   : > { %v538_v31 = vadd.f32 %v515_v27, %v438_v25  ;;  %v539_v32 = vadd.f32 %v535_v28, %v458_v24 }
 0x12e   : > { %v545_v33 = vadd.f32 %v543_v26, %v538_v31  ;;  %v546_v34 = vadd.f32 %v543_v26, %v539_v32  ;;  %v574_v32 = vld [vmem:[%s1275_s4] sm:$0xff] }
 0x130   : > { %v547_v35 = vmax.f32 %v545_v33, 0.0  ;;  %v548_v36 = vmax.f32 %v546_v34, 0.0 }
 0x132   : > { %585 = vrot.lane.b32.xlu0 %v548_v36, %s949_s12  ;;  %575 = vrot.lane.b32.xlu1 %v547_v35, %s948_s11 }
 0x133   : > { %583 = vrot.lane.b32.xlu2 %v547_v35, %s949_s12 }
 0x13a   : > { %695 = vrot.lane.b32.xlu0 %v547_v35, %s953_s16  ;;  %697 = vrot.lane.b32.xlu1 %v548_v36, %s953_s16 }
 0x13b   : > { %577 = vrot.lane.b32.xlu2 %v548_v36, %s948_s11 }
 0x142   : > { %689 = vrot.lane.b32.xlu0 %v548_v36, %s954_s17  ;;  %566 = vrot.lane.b32.xlu1 %v547_v35, %s950_s13 }
 0x143   : > { %687 = vrot.lane.b32.xlu2 %v547_v35, %s954_s17 }
 0x14a   : > { %679 = vrot.lane.b32.xlu0 %v547_v35, %s955_s18  ;;  %681 = vrot.lane.b32.xlu1 %v548_v36, %s955_s18 }
 0x14b   : > { %568 = vrot.lane.b32.xlu2 %v548_v36, %s950_s13 }
 0x152   : > { %560 = vrot.lane.b32.xlu0 %v548_v36, %s951_s14  ;;  %550 = vrot.lane.b32.xlu1 %v547_v35, %s952_s15 }
 0x153   : > { %558 = vrot.lane.b32.xlu2 %v547_v35, %s951_s14 }
 0x15a   : > { %765 = vperm.xlu1 %935, %v761_v37   ;;  %752 = vperm.xlu0 %936, %v549_v56  }
 0x15b   : > { %552 = vrot.lane.b32.xlu2 %v548_v36, %s952_s15 }
 0x163   : > { %770 = vperm.xlu2 %937, %v762_v6  }
 0x18d   : > { %v584_v38 = vpop.permute.xlu2 %583 }
 0x195   : > { %v578_v39 = vpop.permute.xlu2 %577 }
 0x19d   : > { %v688_v44 = vpop.permute.xlu2 %687 }
 0x1a4   : > { %v586_v40 = vpop.permute.xlu0 %585  ;;  %v576_v41 = vpop.permute.xlu1 %575 }
 0x1a5   : > { %v587_v47 = vsel %vm364_vm0, %v584_v38, %v586_v40  ;;  %v588_v48 = vsel %vm364_vm0, %v586_v40, %v584_v38  ;;  %v579_v51 = vsel %vm353_vm1, %v576_v41, %v578_v39  ;;  %v580_v52 = vsel %vm353_vm1, %v578_v39, %v576_v41  ;;  %v569_v61 = vpop.permute.xlu2 %568 }
 0x1a6   : > { %v589_v49 = vmul.f32 %v587_v47, %v367_v10  ;;  %v590_v50 = vmul.f32 %v588_v48, %v368_v11  ;;  %v581_v53 = vmul.f32 %v580_v52, %v356_v18  ;;  %v582_v54 = vmul.f32 %v579_v51, %v357_v19  ;;  %v902_v10 = vld [vmem:[%s1275_s4 + $0x8] sm:$0xff] }
 0x1a7   : > { %v760_v47 = vld [vmem:[%s1277_s6 + $0x8] sm:$0xff] }
 0x1a8   : > { %609 = vmatpush.msra.mxu2 %v589_v49  ;;  %629 = vmatpush.msra.mxu3 %v590_v50 }
 0x1aa   : > { %610 = vmatpush.msra.mxu2 %v547_v35  ;;  %630 = vmatpush.msra.mxu3 %v548_v36 }
 0x1ac   : > { %v696_v11 = vpop.permute.xlu0 %695  ;;  %v698_v55 = vpop.permute.xlu1 %697  ;;  %611 = vmatpush.msra.mxu2 %v581_v53  ;;  %631 = vmatpush.msra.mxu3 %v582_v54 }
 0x1ad   : > { %v699_v18 = vsel %vm486_vm6, %v696_v11, %v698_v55  ;;  %v700_v19 = vsel %vm486_vm6, %v698_v55, %v696_v11  ;;  %903 = vmatmul.msk.f32.vlgmr.msra.gmra.mxu2 %vm373_vm4, %v902_v10  ;;  %904 = vmatmul.msk.f32.vlgmr.msra.gmra.mxu3 %vm373_vm4, %v902_v10  ;;  %v559_v13 = vpop.permute.xlu2 %558 }
 0x1ae   : > { %v701_v57 = vmul.f32 %v1103_v45, %v699_v18  ;;  %v702_v60 = vmul.f32 %v1108_v46, %v700_v19 }
 0x1b0   : > { %721 = vmatpush.msrb.mxu2 %v701_v57  ;;  %741 = vmatpush.msrb.mxu3 %v702_v60 }
 0x1b4   : > { %v690_v62 = vpop.permute.xlu0 %689  ;;  %v567_v63 = vpop.permute.xlu1 %566 }
 0x1b5   : > { %v691_v0 = vsel %vm475_vm7, %v688_v44, %v690_v62  ;;  %v692_v1 = vsel %vm475_vm7, %v690_v62, %v688_v44  ;;  %v570_v2 = vsel %vm341_vm2, %v567_v63, %v569_v61  ;;  %v571_v45 = vsel %vm341_vm2, %v569_v61, %v567_v63  ;;  %v553_v17 = vpop.permute.xlu2 %552  ;;  %v759_v44 = vld [vmem:[%s1277_s6] sm:$0xff] }
 0x1b6   : > { %v693_v46 = vmul.f32 %v691_v0, %v478_v58  ;;  %v694_v5 = vmul.f32 %v692_v1, %v479_v59  ;;  %v572_v9 = vmul.f32 %v571_v45, %v344_v22  ;;  %v573_v12 = vmul.f32 %v570_v2, %v345_v23  ;;  %v907_v23 = vld [vmem:[%s1275_s4 + $0x10] sm:$0xff] }
 0x1b8   : > { %652 = vmatpush.msrb.mxu0 %v572_v9  ;;  %672 = vmatpush.msrb.mxu1 %v573_v12 }
 0x1b9   : > { %722 = vmatpush.msrb.mxu2 %v693_v46  ;;  %742 = vmatpush.msrb.mxu3 %v694_v5 }
 0x1bc   : > { %v680_v14 = vpop.permute.xlu0 %679  ;;  %v682_v15 = vpop.permute.xlu1 %681 }
 0x1bd   : > { %v683_v16 = vsel %vm464_vm8, %v680_v14, %v682_v15  ;;  %v684_v58 = vsel %vm464_vm8, %v682_v15, %v680_v14  ;;  %v771_v53 = vpop.permute.xlu2 %770 }
 0x1be   : > { %v685_v59 = vmul.f32 %v683_v16, %v467_v3  ;;  %v686_v22 = vmul.f32 %v684_v58, %v468_v4 }
 0x1c0   : > { %723 = vmatpush.msrb.mxu2 %v685_v59  ;;  %743 = vmatpush.msrb.mxu3 %v686_v22 }
 0x1c1   : > { %908 = vmatmul.msk.f32.vlgmr.msrb.gmra.mxu2 %vm373_vm4, %v907_v23  ;;  %909 = vmatmul.msk.f32.vlgmr.msrb.gmra.mxu3 %vm373_vm4, %v907_v23 }
 0x1c4   : > { %v561_v20 = vpop.permute.xlu0 %560  ;;  %v551_v21 = vpop.permute.xlu1 %550 }
 0x1c5   : > { %v562_v24 = vsel %vm330_vm3, %v559_v13, %v561_v20  ;;  %v563_v3 = vsel %vm330_vm3, %v561_v20, %v559_v13  ;;  %v554_v4 = vsel %vm319_vm5, %v551_v21, %v553_v17  ;;  %v555_v25 = vsel %vm319_vm5, %v553_v17, %v551_v21 }
 0x1c6   : > { %v564_v26 = vmul.f32 %v563_v3, %v333_v29  ;;  %v565_v27 = vmul.f32 %v562_v24, %v334_v30  ;;  %v556_v28 = vmul.f32 %v555_v25, %v322_v42  ;;  %v557_v31 = vmul.f32 %v554_v4, %v323_v43 }
 0x1c8   : > { %653 = vmatpush.msrb.mxu0 %v564_v26  ;;  %673 = vmatpush.msrb.mxu1 %v565_v27 }
 0x1ca   : > { %654 = vmatpush.msrb.mxu0 %v556_v28  ;;  %674 = vmatpush.msrb.mxu1 %v557_v31 }
 0x1cb   : > { %905 = vmatmul.msk.f32.vlgmr.msrb.gmra.mxu0 %vm373_vm4, %v574_v32  ;;  %906 = vmatmul.msk.f32.vlgmr.msrb.gmra.mxu1 %vm373_vm4, %v574_v32 }
 0x1cc   : > { %v753_v35 = vpop.permute.xlu0 %752  ;;  %v766_v48 = vpop.permute.xlu1 %765 }
 0x230   : > { %v613_v7 = vpop.f32.mrf.mxu2  ;;  %v633_v29 = vpop.f32.mrf.mxu3 }
 0x244   : > { %v725_v30 = vpop.f32.mrf.mxu2  ;;  %v745_v8 = vpop.f32.mrf.mxu3 }
 0x248   : > { %v656_v42 = vpop.f32.mrf.mxu0  ;;  %v676_v43 = vpop.f32.mrf.mxu1 }
 0x249   : > { %v657_v33 = vadd.f32 %v656_v42, %v613_v7  ;;  %v677_v34 = vadd.f32 %v676_v43, %v633_v29 }
 0x24b   : > { %v748_v36 = vadd.f32 %v725_v30, %v657_v33  ;;  %v749_v37 = vadd.f32 %v745_v8, %v677_v34 }
 0x24d   : > { %v755_v38 = vadd.f32 %v753_v35, %v748_v36  ;;  %v756_v39 = vadd.f32 %v753_v35, %v749_v37 }
 0x24f   : > { %v757_v40 = vmax.f32 %v755_v38, 0.0  ;;  %v758_v41 = vmax.f32 %v756_v39, 0.0 }
 0x251   : > { %795 = vmatpush.msra.mxu0 %v757_v40  ;;  %818 = vmatpush.msra.mxu1 %v758_v41 }
 0x252   : > { %910 = vmatmul.msk.f32.vlgmr.msra.gmra.mxu0 %vm773_vm9, %v759_v44  ;;  %912 = vmatmul.msk.f32.vlgmr.msra.gmra.mxu1 %vm773_vm9, %v759_v44 }
 0x25a   : > { %911 = vmatmul.msk.f32.gmra.mxu0 %vm773_vm9, %v760_v47  ;;  %913 = vmatmul.msk.f32.gmra.mxu1 %vm773_vm9, %v760_v47 }
 0x2cf   : > { %v797_v49 = vpop.f32.mrf.mxu0  ;;  %v820_v50 = vpop.f32.mrf.mxu1 }
 0x2d0   : > { %v798_v51 = vadd.f32 %v797_v49, %v766_v48  ;;  %v821_v52 = vadd.f32 %v820_v50, %v766_v48 }
 0x2d2   : > { %826 = vst [vmem:[%s305_s22] sm:$0xff] %v798_v51 }
 0x2d3   : > { %827 = vst [vmem:[%s305_s22 + $0x8] sm:$0xff] %v821_v52 }
 0x2d7   : > { %v800_v54 = vpop.f32.mrf.mxu0  ;;  %v823_v10 = vpop.f32.mrf.mxu1 }
 0x2d8   : > { %v801_v11 = vadd.f32 %v800_v54, %v771_v53  ;;  %v824_v55 = vadd.f32 %v823_v10, %v771_v53 }
 0x2da   : > { %828 = vst [vmem:[%s305_s22 + $0x10] sm:$0xff] %v801_v11 }
 0x2db   : > { %829 = vst [vmem:[%s305_s22 + $0x18] sm:$0xff] %v824_v55 }
 0x2dc PF: > { %s18_s27 = sadd.s32 1, %s946_s27  }
 0x2dd   : > { %p15_p4 = scmp.ge.s32.totalorder %s18_s27, 4  }
 0x2df   :  { %17 = sbr.rel (!%p15_p4) target bundleno = 1 (0x1), region = 86 }

</bundles_post_ra>
